<compile_context>
chip_gen: v7x
topology: tpu7x:2x2x1
jax: 0.10.0
libtpu: 0.0.40
codegen_flags: <defaults>
</compile_context>

<pallas_src>
import math

import jax
import jax.numpy as jnp
from jax import lax
from jax.experimental import pallas as pl
from jax.experimental.pallas import tpu as pltpu


def _head_kernel(x_ref, w1_ref, b1_ref, w2_ref, b2_ref, o_ref):
    # Cast the activation tile to the weight dtype (bf16) for the MXU; keep
    # the accumulator, bias adds and tanh in f32 (required on v5e VPU/EUP).
    x = x_ref[...].astype(w1_ref.dtype)                            # (TB, H)
    # dense: x @ W1^T  (W1 is PyTorch (out, in) -> contract dim 1 with dim 1)
    h = lax.dot_general(x, w1_ref[...],
                        dimension_numbers=(((1,), (1,)), ((), ())),
                        preferred_element_type=jnp.float32)        # (TB, H) f32
    h = jnp.tanh(h + b1_ref[...])                                  # f32 (EUP)
    # out_proj: h @ W2^T  (W2 lane-padded to (Lp, H))
    out = lax.dot_general(h.astype(w2_ref.dtype), w2_ref[...],
                          dimension_numbers=(((1,), (1,)), ((), ())),
                          preferred_element_type=jnp.float32)      # (TB, Lp) f32
    o_ref[...] = (out + b2_ref[...]).astype(o_ref.dtype)


def prepare_head_params(w_dense, b_dense, w_out, b_out,
                        *, weight_dtype=jnp.bfloat16, lane=128):
    """One-time parameter preparation (do at load time, NOT per forward call).

    Keeps PyTorch (out, in) layout, casts weights to bf16, and lane-pads the
    num_labels axis up to a multiple of 128 for a lane-dense output store.
    """
    H = w_dense.shape[0]
    L = w_out.shape[0]
    Lp = ((L + lane - 1) // lane) * lane
    w1 = jnp.asarray(w_dense, dtype=weight_dtype)                 # (H, H)
    b1 = jnp.asarray(b_dense, dtype=jnp.float32)[None, :]         # (1, H)
    w2 = jnp.pad(jnp.asarray(w_out, dtype=weight_dtype),
                 ((0, Lp - L), (0, 0)))                           # (Lp, H)
    b2 = jnp.pad(jnp.asarray(b_out, dtype=jnp.float32),
                 (0, Lp - L))[None, :]                            # (1, Lp)
    return dict(w1=w1, b1=b1, w2=w2, b2=b2,
                hidden_size=H, num_labels=L, padded_labels=Lp)


def wav2vec2_classification_head(features, params, *, block_b=1024):
    """features: (B, H); params: output of prepare_head_params. Returns (B, L)."""
    B, H = features.shape
    assert H == params["hidden_size"]
    L, Lp = params["num_labels"], params["padded_labels"]
    w1, b1, w2, b2 = params["w1"], params["b1"], params["w2"], params["b2"]

    # Batch tiling: full batch in one step if small, else TB-row tiles.
    TB = B if B <= block_b else block_b
    Bp = math.ceil(B / TB) * TB
    x = features if Bp == B else jnp.pad(features, ((0, Bp - B), (0, 0)))
    grid = (Bp // TB,)

    x_bytes = x.dtype.itemsize
    w_bytes = w1.dtype.itemsize
    # Conservative per-step VMEM estimate (everything double-buffered),
    # clamped so defaults are valid on v5e/v6e/v7x alike.
    vmem_est = (2 * (TB * H * x_bytes + TB * Lp * 4)
                + 2 * ((H * H + Lp * H) * w_bytes + (H + Lp) * 4))
    vmem_limit = int(min(max(2 * vmem_est, 32 * 1024 * 1024), 64 * 1024 * 1024))

    cost = pl.CostEstimate(
        flops=2 * Bp * H * H + 2 * Bp * H * Lp,
        transcendentals=Bp * H,
        bytes_accessed=(x.size * x_bytes + (H * H + Lp * H) * w_bytes
                        + (H + Lp) * 4 + Bp * Lp * 4),
    )

    out = pl.pallas_call(
        _head_kernel,
        out_shape=jax.ShapeDtypeStruct((Bp, Lp), features.dtype),
        grid=grid,
        in_specs=[
            pl.BlockSpec((TB, H), lambda i: (i, 0)),    # x: tiled over batch
            pl.BlockSpec((H, H), lambda i: (0, 0)),     # W1: VMEM-resident
            pl.BlockSpec((1, H), lambda i: (0, 0)),     # b1
            pl.BlockSpec((Lp, H), lambda i: (0, 0)),    # W2 (lane-padded)
            pl.BlockSpec((1, Lp), lambda i: (0, 0)),    # b2 (lane-padded)
        ],
        out_specs=pl.BlockSpec((TB, Lp), lambda i: (i, 0)),
        compiler_params=pltpu.CompilerParams(
            dimension_semantics=("parallel",),
            vmem_limit_bytes=vmem_limit,
        ),
        cost_estimate=cost,
    )(x, w1, b1, w2, b2)

    # Strip batch padding and the lane padding of the label axis.
    return out[:B, :L]


def _reference(features, w_dense, b_dense, w_out, b_out):
    h = jnp.tanh(features @ w_dense.T + b_dense)
    return h @ w_out.T + b_out


if __name__ == "__main__":
    # Small config consistent with the module: hidden_size=32, num_labels=4.
    B, H, L = 2, 32, 4
    key = jax.random.PRNGKey(0)
    k_x, k_w1, k_b1, k_w2, k_b2 = jax.random.split(key, 5)

    features = jax.random.normal(k_x, (B, H), dtype=jnp.float32)
    # PyTorch nn.Linear parameter layout: (out_features, in_features).
    w_dense = jax.random.normal(k_w1, (H, H), dtype=jnp.float32) * 0.05
    b_dense = jax.random.normal(k_b1, (H,), dtype=jnp.float32) * 0.01
    w_out = jax.random.normal(k_w2, (L, H), dtype=jnp.float32) * 0.05
    b_out = jax.random.normal(k_b2, (L,), dtype=jnp.float32) * 0.01

    # One-time prep: keep (out,in) layout, bf16 weights, lane-pad labels.
    params = prepare_head_params(w_dense, b_dense, w_out, b_out)

    logits = wav2vec2_classification_head(features, params)
    logits = jax.block_until_ready(logits)

    ref = _reference(features, w_dense, b_dense, w_out, b_out)
    assert logits.shape == (B, L)
    # bf16 weights/activations feed the MXU (f32 accumulation) -> loose-ish tol.
    assert jnp.allclose(logits, ref, atol=2e-2, rtol=2e-2), (
        float(jnp.max(jnp.abs(logits - ref))))

    print("KERNEL_OK")
</pallas_src>

<mosaic_0001>
module attributes {stable_mosaic.version = 11 : i64} {
  func.func @_head_kernel(%arg0: i32, %arg1: memref<2x32xf32, #tpu.memory_space<vmem>>, %arg2: memref<32x32xbf16, #tpu.memory_space<vmem>>, %arg3: memref<1x32xf32, #tpu.memory_space<vmem>>, %arg4: memref<128x32xbf16, #tpu.memory_space<vmem>>, %arg5: memref<1x128xf32, #tpu.memory_space<vmem>>, %arg6: memref<2x128xf32, #tpu.memory_space<vmem>>) attributes {dimension_semantics = [#tpu.dimension_semantics<parallel>], iteration_bounds = array<i64: 1>, scalar_prefetch = 0 : i64, scratch_operands = 0 : i64, tpu.core_type = #tpu.core_type<tc>, window_params = [{transform_indices = @transform_0, window_bounds = array<i64: 2, 32>}, {pipeline_mode = #tpu.pipeline_mode<synchronous>, transform_indices = @transform_1, window_bounds = array<i64: 32, 32>}, {pipeline_mode = #tpu.pipeline_mode<synchronous>, transform_indices = @transform_2, window_bounds = array<i64: 1, 32>}, {pipeline_mode = #tpu.pipeline_mode<synchronous>, transform_indices = @transform_3, window_bounds = array<i64: 128, 32>}, {pipeline_mode = #tpu.pipeline_mode<synchronous>, transform_indices = @transform_4, window_bounds = array<i64: 1, 128>}, {transform_indices = @transform_5, window_bounds = array<i64: 2, 128>}]} {
    %c0 = arith.constant 0 : index
    %c0_0 = arith.constant 0 : index
    %0 = vector.load %arg1[%c0, %c0_0] : memref<2x32xf32, #tpu.memory_space<vmem>>, vector<2x32xf32>
    %1 = arith.truncf %0 : vector<2x32xf32> to vector<2x32xbf16>
    %c0_1 = arith.constant 0 : index
    %c0_2 = arith.constant 0 : index
    %2 = vector.load %arg2[%c0_1, %c0_2] : memref<32x32xbf16, #tpu.memory_space<vmem>>, vector<32x32xbf16>
    %cst = arith.constant dense<0.000000e+00> : vector<2x32xf32>
    %3 = tpu.matmul %1, %2, %cst {dimension_numbers = #tpu.dot_dimension_numbers<[1], [1], [0], [0], [0, 0, 1, 0], [], []>} : vector<2x32xbf16>, vector<32x32xbf16>, vector<2x32xf32> -> vector<2x32xf32>
    %c0_3 = arith.constant 0 : index
    %c0_4 = arith.constant 0 : index
    %4 = vector.load %arg3[%c0_3, %c0_4] : memref<1x32xf32, #tpu.memory_space<vmem>>, vector<1x32xf32>
    %5 = vector.broadcast %4 : vector<1x32xf32> to vector<2x32xf32>
    %6 = arith.addf %3, %5 : vector<2x32xf32>
    %7 = math.tanh %6 : vector<2x32xf32>
    %8 = arith.truncf %7 : vector<2x32xf32> to vector<2x32xbf16>
    %c0_5 = arith.constant 0 : index
    %c0_6 = arith.constant 0 : index
    %9 = vector.load %arg4[%c0_5, %c0_6] : memref<128x32xbf16, #tpu.memory_space<vmem>>, vector<128x32xbf16>
    %cst_7 = arith.constant dense<0.000000e+00> : vector<2x128xf32>
    %10 = tpu.matmul %8, %9, %cst_7 {dimension_numbers = #tpu.dot_dimension_numbers<[1], [1], [0], [0], [0, 0, 1, 0], [], []>} : vector<2x32xbf16>, vector<128x32xbf16>, vector<2x128xf32> -> vector<2x128xf32>
    %c0_8 = arith.constant 0 : index
    %c0_9 = arith.constant 0 : index
    %11 = vector.load %arg5[%c0_8, %c0_9] : memref<1x128xf32, #tpu.memory_space<vmem>>, vector<1x128xf32>
    %12 = vector.broadcast %11 : vector<1x128xf32> to vector<2x128xf32>
    %13 = arith.addf %10, %12 : vector<2x128xf32>
    %c0_10 = arith.constant 0 : index
    %c0_11 = arith.constant 0 : index
    %14 = vector.load %arg6[%c0_10, %c0_11] : memref<2x128xf32, #tpu.memory_space<vmem>>, vector<2x128xf32>
    tpu.vector_store %arg6[%c0_10, %c0_11], %13 {strides = array<i32>} : memref<2x128xf32, #tpu.memory_space<vmem>>, vector<2x128xf32>,
    return
  }
  func.func @transform_0(%arg0: i32) -> (i32, i32) {
    %c0_i32 = arith.constant 0 : i32
    %c0_i32_0 = arith.constant 0 : i32
    return %arg0, %c0_i32 : i32, i32
  }
  func.func @transform_1(%arg0: i32) -> (i32, i32) {
    %c0_i32 = arith.constant 0 : i32
    %c0_i32_0 = arith.constant 0 : i32
    %c0_i32_1 = arith.constant 0 : i32
    return %c0_i32, %c0_i32_0 : i32, i32
  }
  func.func @transform_2(%arg0: i32) -> (i32, i32) {
    %c0_i32 = arith.constant 0 : i32
    %c0_i32_0 = arith.constant 0 : i32
    %c0_i32_1 = arith.constant 0 : i32
    return %c0_i32, %c0_i32_0 : i32, i32
  }
  func.func @transform_3(%arg0: i32) -> (i32, i32) {
    %c0_i32 = arith.constant 0 : i32
    %c0_i32_0 = arith.constant 0 : i32
    %c0_i32_1 = arith.constant 0 : i32
    return %c0_i32, %c0_i32_0 : i32, i32
  }
  func.func @transform_4(%arg0: i32) -> (i32, i32) {
    %c0_i32 = arith.constant 0 : i32
    %c0_i32_0 = arith.constant 0 : i32
    %c0_i32_1 = arith.constant 0 : i32
    return %c0_i32, %c0_i32_0 : i32, i32
  }
  func.func @transform_5(%arg0: i32) -> (i32, i32) {
    %c0_i32 = arith.constant 0 : i32
    %c0_i32_0 = arith.constant 0 : i32
    return %arg0, %c0_i32 : i32, i32
  }
}

</mosaic_0001>

<bundles_post_ra>
// kernel: tpu_custom_call.1
= control target key start
LH: loop header
LB: loop body
LE: loop exit
PB: predicated region body
PF: predicated region fallthrough
CT: control target
= control target key end

     0   :  { %v335_v1 = vmov 0.0   ;;  %vm45_vm0 = vcmask 261120   ;;  %vm336_vm1 = vmmov 0   ;;  %s431_s0 = inlined_call_operand.vmem [shape: f32[2,32], index: 0, kind: input, shape index: {}]   ;;  %s432_s1 = inlined_call_operand.vmem [shape: bf16[32,32], index: 1, kind: input, shape index: {}]   ;;  %s433_s2 = inlined_call_operand.vmem [shape: f32[1,32], index: 2, kind: input, shape index: {}]   ;;  %s434_s3 = inlined_call_operand.vmem [shape: bf16[128,32], index: 3, kind: input, shape index: {}]   ;;  %s435_s4 = inlined_call_operand.vmem [shape: f32[1,128], index: 4, kind: input, shape index: {}]   ;;  %s436_s5 = inlined_call_operand.hbm [shape: f32[2,128], index: 5, kind: output, shape index: {}]  }
   0x1   :  { %v299_v0 = vld [vmem:[%s432_s1] sm:$0xff]   ;;  %268 = vmatprep.subr.bf16.mxu0 %v335_v1  ;;  %276 = vmatprep.subr.bf16.mxu1 %v335_v1  ;;  %v300_v4 = vld [vmem:[%s432_s1 + $0x8] sm:$0xff]  }
   0x2   :  { %v50_v2 = vsel %vm45_vm0, %v299_v0, 0  ;;  %272 = vmatprep.mubr.msk.bf16.mxu0 %vm336_vm1, %v335_v1  ;;  %v301_v3 = vld [vmem:[%s434_s3] sm:$0xff]   ;;  %292 = vmatprep.mubr.msk.bf16.mxu1 %vm336_vm1, %v335_v1  ;;  %v302_v6 = vld [vmem:[%s434_s3 + $0x8] sm:$0xff]   ;;  %v53_v7 = vsel %vm45_vm0, %v300_v4, 0 }
   0x3   :  { %269 = vmatpush3.bf16.xpose.msra.mxu0 %v50_v2  ;;  %v164_v5 = vsel %vm45_vm0, %v301_v3, 0  ;;  %v22_v8 = vld [vmem:[%s431_s0] sm:$0x3]  ;;  %v167_v9 = vsel %vm45_vm0, %v302_v6, 0 }
   0x4   :  { %270 = vmatprep.subr.bf16.mxu0 %v335_v1  ;;  %277 = vmatpush3.bf16.xpose.msra.mxu1 %v164_v5 }
   0x5   :  { %278 = vmatprep.subr.bf16.mxu1 %v335_v1 }
   0xb   :  { %271 = vmatpush3.bf16.xpose.msra.mxu0 %v53_v7 }
   0xc   :  { %10 = vsyncpa [#allocation3], 0  ;;  %v23_v10 = vpack.c.bf16 %v22_v8, %v22_v8  ;;  %279 = vmatpush3.bf16.xpose.msra.mxu1 %v167_v9  ;;  %v303_v11 = vld [vmem:[%s434_s3 + $0x10] sm:$0xff]   ;;  %v304_v13 = vld [vmem:[%s434_s3 + $0x18] sm:$0xff]  }
   0xd   :  { %280 = vmatprep.subr.bf16.mxu1 %v335_v1  ;;  %v170_v12 = vsel %vm45_vm0, %v303_v11, 0  ;;  %v173_v14 = vsel %vm45_vm0, %v304_v13, 0  ;;  %v305_v15 = vld [vmem:[%s434_s3 + $0x20] sm:$0xff]   ;;  %v306_v17 = vld [vmem:[%s434_s3 + $0x28] sm:$0xff]   ;;  %v307_v19 = vld [vmem:[%s434_s3 + $0x30] sm:$0xff]  }
   0xe   :  { %v176_v16 = vsel %vm45_vm0, %v305_v15, 0  ;;  %v179_v18 = vsel %vm45_vm0, %v306_v17, 0  ;;  %v182_v20 = vsel %vm45_vm0, %v307_v19, 0  ;;  %v308_v21 = vld [vmem:[%s434_s3 + $0x38] sm:$0xff]   ;;  %v242_v23 = vld [vmem:[%s433_s2] ss:$0 sm:$0xff] }
   0xf   :  { %v185_v22 = vsel %vm45_vm0, %v308_v21, 0  ;;  %v246_v31 = vld [vmem:[%s435_s4] ss:$0 sm:$0xff]  ;;  %s337_s3 = smov [#allocation2]  }
  0x10   :  { %s234_s17 = sshll.u32 %s337_s3, 4  ;;  %s235_s17 = int_to_ptr.vmem [resolvable:$true] %s234_s17 }
  0x11   :  { %s311_s2 = scalar_lea.vmem %s235_s17, 32  ;;  %p316_p1 = scmp.lt.s32.totalorder %s235_s17, %s235_s17 }
  0x12   :  { %273 = vmatmul.mubr.msk.bf16.vlgmr.msra.gmra.mrb[0].mxu0 %vm45_vm0, %v23_v10  ;;  %p312_p0 = scmp.ne.s32.totalorder %s235_s17, %s311_s2  ;;  %p317_p2 = scmp.lt.s32.totalorder %s311_s2, %s311_s2 }
  0x14   :  { %281 = vmatpush3.bf16.xpose.msra.mxu1 %v170_v12  ;;  %p318_p3 = por %p317_p2, %p316_p1 }
  0x15   :  { %282 = vmatprep.subr.bf16.mxu1 %v335_v1 }
  0x16   :  { %p319_p4 = pnand %p318_p3, %p312_p0 }
  0x1c   :  { %283 = vmatpush3.bf16.xpose.msra.mxu1 %v173_v14 }
  0x1d   :  { %284 = vmatprep.subr.bf16.mxu1 %v335_v1 }
  0x24   :  { %285 = vmatpush3.bf16.xpose.msra.mxu1 %v176_v16 }
  0x25   :  { %286 = vmatprep.subr.bf16.mxu1 %v335_v1 }
  0x2c   :  { %287 = vmatpush3.bf16.xpose.msra.mxu1 %v179_v18 }
  0x2d   :  { %288 = vmatprep.subr.bf16.mxu1 %v335_v1 }
  0x34   :  { %289 = vmatpush3.bf16.xpose.msra.mxu1 %v182_v20 }
  0x35   :  { %290 = vmatprep.subr.bf16.mxu1 %v335_v1 }
  0x3c   :  { %291 = vmatpush3.bf16.xpose.msra.mxu1 %v185_v22 }
  0xe5   :  { %v89_v24 = vpop.f32.mrb[0].mxu0 }
  0xe6   :  { %v90_v25 = vadd.f32 %v242_v23, %v89_v24  ;;  %v274_v26 = vpop.f32.mrb[1].mxu0 }
  0xe7   :  { %v92_v27 = vpop.f32.mrb[2].mxu0 }
  0xe8   :  { %309 = vtanh.f32 %v90_v25  ;;  %v275_v28 = vpop.f32.mrb[3].mxu0 }
  0xf2   :  { %v310_v29 = vpop.eup %309 }
  0xf3   :  { %v96_v30 = vpack.c.bf16 %v310_v29, %v310_v29 }
  0xf5   :  { %293 = vmatmul.mubr.msk.bf16.vlgmr.msra.gmra.mrb[0].mxu1 %vm45_vm0, %v96_v30 }
 0x1c8   :  { %v221_v32 = vpop.f32.mrb[0].mxu1 }
 0x1c9   :  { %v222_v33 = vadd.f32 %v246_v31, %v221_v32  ;;  %v294_v34 = vpop.f32.mrb[1].mxu1 }
 0x1ca   :  { %v224_v35 = vpop.f32.mrb[2].mxu1 }
 0x1cb   :  { %227 = vst [vmem:[#allocation2] sm:$0x3] %v222_v33  ;;  %v295_v36 = vpop.f32.mrb[3].mxu1 }
 0x1cc   :  { %322 = shalt.err (!%p319_p4)
}
 0x1cd   :  { %s323_s4 = scalar_lea.hbm %s436_s5, 32 }
 0x1ce   :  { %p324_p5 = scmp.ne.s32.totalorder %s436_s5, %s323_s4  ;;  %p327_p6 = scmp.lt.u32.totalorder %s323_s4, %s436_s5 }
 0x1d0   :  { %p329_p7 = pnand %p327_p6, %p324_p5 }
 0x1d2   :  { %332 = shalt.err (!%p329_p7)
}
 0x1d3   :  { %237 = dma.vmem_to_hbm [thread:$0]  %s235_s17, 32, %s436_s5, [#allocation3]  }
 0x1d4   :  { %333 = dma.done.wait [#allocation3], 32  }
 0x1d5   :  { %334 = vsyncadd [#allocation3], 4294967264 }
 0x1d6   :  { %241 = vsyncpa [#allocation3], 1 }

</bundles_post_ra>
